<compile_context>
chip_gen: v5e
topology: v5e:2x2
jax: 0.10.0
libtpu: 0.0.40
codegen_flags: <defaults>
</compile_context>

<pallas_src>
import math

import jax
import jax.numpy as jnp
from jax.experimental import pallas as pl
from jax.experimental.pallas import tpu as pltpu


# ---------------------------------------------------------------------------
# Kernel
# ---------------------------------------------------------------------------
def _make_mha_kernel(n_heads, d_k, d_v, has_mask):
    scale = 1.0 / math.sqrt(d_k)

    def kernel(*refs):
        if has_mask:
            (q_ref, kT_ref, v_ref, bias_ref,
             wq_ref, bq_ref, wkT_ref, bk_ref, wv_ref, bv_ref, wo_ref, bo_ref,
             out_ref, qh_ref, s_ref, oacc_ref) = refs
        else:
            (q_ref, kT_ref, v_ref,
             wq_ref, bq_ref, wkT_ref, bk_ref, wv_ref, bv_ref, wo_ref, bo_ref,
             out_ref, qh_ref, s_ref, oacc_ref) = refs
            bias_ref = None

        ki = pl.program_id(2)
        n_k = pl.num_programs(2)

        # ---- once per (batch, q-tile): project + scale Q, zero accumulator --
        @pl.when(ki == 0)
        def _():
            q = q_ref[0]                                    # [tq, d_model] bf16
            qh = jnp.dot(q, wq_ref[...],
                         preferred_element_type=jnp.float32) + bq_ref[...]
            qh_ref[...] = (qh * scale).astype(jnp.bfloat16)  # scale on Q, not scores
            oacc_ref[...] = jnp.zeros_like(oacc_ref)

        # ---- per k-tile: project K (pre-transposed) and V -------------------
        kT = kT_ref[0]                                      # [d_model, tk] bf16
        v = v_ref[0]                                        # [tk, d_model] bf16
        khT = jnp.dot(wkT_ref[...], kT,
                      preferred_element_type=jnp.float32) + bk_ref[...]
        khT_b = khT.astype(jnp.bfloat16)                    # [H*d_k, tk]
        vh = jnp.dot(v, wv_ref[...],
                     preferred_element_type=jnp.float32) + bv_ref[...]
        vh_b = vh.astype(jnp.bfloat16)                      # [tk, H*d_v]

        if has_mask:
            mask_bias = bias_ref[...]                       # [tq, tk] additive 0/-inf

        # ---- per-head scores into the stacked VMEM scratch [H, tq, tk] ------
        # K^T is sliced along sublanes (rows); no transposed-RHS matmul.
        for h in range(n_heads):
            qh_h = qh_ref[:, h * d_k:(h + 1) * d_k]         # [tq, d_k]  bf16
            khT_h = khT_b[h * d_k:(h + 1) * d_k, :]         # [d_k, tk]  bf16
            s = jnp.dot(qh_h, khT_h, preferred_element_type=jnp.float32)
            if has_mask:
                s = s + mask_bias
            s_ref[h] = s

        # ---- softmax over the HEADS axis (nn.Softmax() legacy dim=1) --------
        smax = s_ref[0]
        for h in range(1, n_heads):
            smax = jnp.maximum(smax, s_ref[h])
        denom = jnp.zeros_like(smax)
        for h in range(n_heads):
            e_h = jnp.exp(s_ref[h] - smax)
            s_ref[h] = e_h                                  # exp() in place
            denom = denom + e_h
        inv_denom = pl.reciprocal(denom, approx=True)       # EUP slot, not VALU

        # ---- P @ V per head, accumulated over k tiles into VMEM scratch -----
        for h in range(n_heads):
            p_h = (s_ref[h] * inv_denom).astype(jnp.bfloat16)   # [tq, tk]
            vh_h = vh_b[:, h * d_v:(h + 1) * d_v]               # [tk, d_v]
            sl = slice(h * d_v, (h + 1) * d_v)
            oacc_ref[:, sl] = oacc_ref[:, sl] + jnp.dot(
                p_h, vh_h, preferred_element_type=jnp.float32)

        # ---- last k tile: single fused output projection ---------------------
        @pl.when(ki == n_k - 1)
        def _():
            o_all = oacc_ref[...].astype(jnp.bfloat16)      # [tq, H*d_v]
            out = jnp.dot(o_all, wo_ref[...],
                          preferred_element_type=jnp.float32) + bo_ref[...]
            out_ref[0] = out.astype(out_ref.dtype)

    return kernel


# ---------------------------------------------------------------------------
# Tiling helpers (VMEM-budget / generation aware)
# ---------------------------------------------------------------------------
def _pick_divisor_tile(n, cap, align):
    """Largest multiple of `align` that divides n and is <= cap; else n (full dim)."""
    if n <= cap:
        return n
    t = (min(cap, n) // align) * align
    while t >= align:
        if n % t == 0:
            return t
        t -= align
    return n


def _vmem_estimate(tq, tk, d_model, n_heads, d_k, d_v):
    f32, bf16 = 4, 2
    scratch = (n_heads * tq * tk * f32            # score / exp scratch
               + tq * n_heads * d_k * bf16        # scaled Q-heads scratch
               + tq * n_heads * d_v * f32)        # P@V accumulator
    blocks = 2 * (tq * d_model * bf16             # Q (double-buffered)
                  + d_model * tk * bf16           # K^T
                  + tk * d_model * bf16           # V
                  + tq * tk * f32                 # mask bias (worst case)
                  + tq * d_model * f32)           # out
    weights = 2 * bf16 * (2 * d_model * n_heads * d_k
                          + 2 * d_model * n_heads * d_v)
    return scratch + blocks + weights


def _pick_tiles(q_len, k_len, d_model, n_heads, d_k, d_v, budget, q_cap, k_cap):
    tq = _pick_divisor_tile(q_len, q_cap, 8)
    tk = _pick_divisor_tile(k_len, k_cap, 128)
    for _ in range(32):
        if _vmem_estimate(tq, tk, d_model, n_heads, d_k, d_v) <= budget:
            break
        if tk > 128:
            new_tk = _pick_divisor_tile(k_len, max(tk // 2, 128), 128)
            if new_tk < tk:
                tk = new_tk
                continue
        if tq > 8:
            new_tq = _pick_divisor_tile(q_len, max(tq // 2, 8), 8)
            if new_tq < tq:
                tq = new_tq
                continue
        break
    return tq, tk


# ---------------------------------------------------------------------------
# Wrapper
# ---------------------------------------------------------------------------
def multi_head_attention(Q, K, V, params, mask=None, q_tile_cap=512, k_tile_cap=2048):
    """Q/K/V: [B, seq, d_model] float32.  params: dict of projection weights."""
    wq, bq, wk, bk, wv, bv, wo, bo = (params[k] for k in
                                      ("wq", "bq", "wk", "bk", "wv", "bv", "wo", "bo"))
    out_dtype = Q.dtype
    B, q_len, d_model = Q.shape
    k_len = K.shape[1]
    n_heads, _, d_k = wq.shape
    d_v = wv.shape[2]

    # ---- generation-aware VMEM limit (v5e/v6e: 128 MiB, v7x: 64 MiB) --------
    try:
        vmem_cap = int(pltpu.get_tpu_info().vmem_capacity_bytes)
    except Exception:
        vmem_cap = 64 * 1024 * 1024                 # conservative (v7x) fallback
    vmem_limit = max(min(vmem_cap * 3 // 4, 112 * 1024 * 1024), 32 * 1024 * 1024)

    tq, tk = _pick_tiles(q_len, k_len, d_model, n_heads, d_k, d_v,
                         budget=int(vmem_limit * 0.8),
                         q_cap=q_tile_cap, k_cap=k_tile_cap)
    n_q, n_k = q_len // tq, k_len // tk
    grid = (B, n_q, n_k)

    # ---- bf16 activations / weights (MXU native); f32 biases ----------------
    bf16 = jnp.bfloat16
    Qb = Q.astype(bf16)
    KTb = jnp.transpose(K, (0, 2, 1)).astype(bf16)          # [B, d_model, k_len]
    Vb = V.astype(bf16)

    # Head-fused projection weights, columns grouped head-major.
    wq_all = jnp.transpose(wq, (1, 0, 2)).reshape(d_model, n_heads * d_k).astype(bf16)
    wkT_all = jnp.transpose(wk, (0, 2, 1)).reshape(n_heads * d_k, d_model).astype(bf16)
    wv_all = jnp.transpose(wv, (1, 0, 2)).reshape(d_model, n_heads * d_v).astype(bf16)
    wo_b = wo.astype(bf16)                                   # [H*d_v, d_model] (un-split)
    bq2 = bq.reshape(1, n_heads * d_k).astype(jnp.float32)
    bk_col = bk.reshape(n_heads * d_k, 1).astype(jnp.float32)
    bv2 = bv.reshape(1, n_heads * d_v).astype(jnp.float32)
    bo2 = bo.reshape(1, d_model).astype(jnp.float32)

    has_mask = mask is not None

    def const(shape):
        return pl.BlockSpec(shape, lambda b, qi, ki: (0,) * len(shape))

    in_specs = [
        pl.BlockSpec((1, tq, d_model), lambda b, qi, ki: (b, qi, 0)),   # Q tile
        pl.BlockSpec((1, d_model, tk), lambda b, qi, ki: (b, 0, ki)),   # K^T tile
        pl.BlockSpec((1, tk, d_model), lambda b, qi, ki: (b, ki, 0)),   # V tile
    ]
    inputs = [Qb, KTb, Vb]
    if has_mask:
        # Precomputed additive bias: 0 where mask != 0, -inf where mask == 0.
        bias = jnp.where(mask == 0, jnp.float32(-jnp.inf), jnp.float32(0.0))
        in_specs.append(pl.BlockSpec((tq, tk), lambda b, qi, ki: (qi, ki)))
        inputs.append(bias)
    in_specs += [
        const((d_model, n_heads * d_k)),     # wq_all
        const((1, n_heads * d_k)),           # bq
        const((n_heads * d_k, d_model)),     # wk_all^T
        const((n_heads * d_k, 1)),           # bk (column)
        const((d_model, n_heads * d_v)),     # wv_all
        const((1, n_heads * d_v)),           # bv
        const((n_heads * d_v, d_model)),     # wo
        const((1, d_model)),                 # bo
    ]
    inputs += [wq_all, bq2, wkT_all, bk_col, wv_all, bv2, wo_b, bo2]

    kernel = _make_mha_kernel(n_heads, d_k, d_v, has_mask)

    out = pl.pallas_call(
        kernel,
        out_shape=jax.ShapeDtypeStruct((B, q_len, d_model), out_dtype),
        grid=grid,
        in_specs=in_specs,
        out_specs=pl.BlockSpec((1, tq, d_model), lambda b, qi, ki: (b, qi, 0)),
        scratch_shapes=[
            pltpu.VMEM((tq, n_heads * d_k), jnp.bfloat16),   # scaled, projected Q heads
            pltpu.VMEM((n_heads, tq, tk), jnp.float32),      # per-head scores / exp
            pltpu.VMEM((tq, n_heads * d_v), jnp.float32),    # sum_k P@V accumulator
        ],
        compiler_params=pltpu.CompilerParams(
            # Softmax is over heads -> no state across (b, qi); k axis carries the
            # P@V accumulation -> "arbitrary".
            dimension_semantics=("parallel", "parallel", "arbitrary"),
            vmem_limit_bytes=int(vmem_limit),
        ),
    )(*inputs)
    return out


# ---------------------------------------------------------------------------
# Plain-JAX reference (mirrors the PyTorch forward exactly, f32 throughout)
# ---------------------------------------------------------------------------
def ref_multi_head_attention(Q, K, V, params, mask=None):
    wq, bq, wk, bk, wv, bv, wo, bo = (params[k] for k in
                                      ("wq", "bq", "wk", "bk", "wv", "bv", "wo", "bo"))
    d_k = wq.shape[2]
    qh = jnp.einsum("bqd,hde->bhqe", Q, wq) + bq[None, :, None, :]
    kh = jnp.einsum("bkd,hde->bhke", K, wk) + bk[None, :, None, :]
    vh = jnp.einsum("bkd,hde->bhke", V, wv) + bv[None, :, None, :]
    att = jnp.einsum("bhqe,bhke->bhqk", qh, kh) / math.sqrt(d_k)
    if mask is not None:
        att = jnp.where(mask[None, None] == 0, -jnp.inf, att)
    p = jax.nn.softmax(att, axis=1)  # softmax over heads (PyTorch legacy dim)
    o = jnp.einsum("bhqk,bhke->bhqe", p, vh)
    o = jnp.transpose(o, (0, 2, 1, 3)).reshape(Q.shape[0], Q.shape[1], -1)
    return o @ wo + bo


def init_params(key, d_model, n_heads, d_k, d_v):
    ks = jax.random.split(key, 8)
    lim_in = 1.0 / math.sqrt(d_model)
    lim_out = 1.0 / math.sqrt(n_heads * d_v)
    u = lambda k, shape, lim: jax.random.uniform(k, shape, jnp.float32, -lim, lim)
    return {
        "wq": u(ks[0], (n_heads, d_model, d_k), lim_in),
        "bq": u(ks[1], (n_heads, d_k), lim_in),
        "wk": u(ks[2], (n_heads, d_model, d_k), lim_in),
        "bk": u(ks[3], (n_heads, d_k), lim_in),
        "wv": u(ks[4], (n_heads, d_model, d_v), lim_in),
        "bv": u(ks[5], (n_heads, d_v), lim_in),
        "wo": u(ks[6], (n_heads * d_v, d_model), lim_out),
        "bo": u(ks[7], (d_model,), lim_out),
    }


if __name__ == "__main__":
    B, q_len, k_len = 2, 8, 8
    d_model, n_heads = 32, 4
    d_k = d_v = d_model // n_heads

    key = jax.random.PRNGKey(0)
    kq, kk, kv, kp = jax.random.split(key, 4)
    Q = jax.random.normal(kq, (B, q_len, d_model), jnp.float32)
    K = jax.random.normal(kk, (B, k_len, d_model), jnp.float32)
    V = jax.random.normal(kv, (B, k_len, d_model), jnp.float32)
    params = init_params(kp, d_model, n_heads, d_k, d_v)

    # Mask-free specialized kernel.
    out = multi_head_attention(Q, K, V, params, mask=None)
    jax.block_until_ready(out)
    ref = ref_multi_head_attention(Q, K, V, params, mask=None)
    assert out.shape == (B, q_len, d_model)
    # Tolerance covers bf16 MXU operands + approx EUP reciprocal.
    assert jnp.allclose(out, ref, atol=5e-2, rtol=5e-2), "mismatch vs reference (no mask)"

    # Masked-kernel variant (all-ones mask: exercises the mask path, NaN-free).
    mask = jnp.ones((q_len, k_len), jnp.float32)
    out_m = multi_head_attention(Q, K, V, params, mask=mask)
    jax.block_until_ready(out_m)
    ref_m = ref_multi_head_attention(Q, K, V, params, mask=mask)
    assert jnp.allclose(out_m, ref_m, atol=5e-2, rtol=5e-2), "mismatch vs reference (mask)"

    print("KERNEL_OK")
</pallas_src>

<mosaic_0001>
module attributes {stable_mosaic.version = 11 : i64} {
  func.func @kernel(%arg0: i32, %arg1: i32, %arg2: i32, %arg3: memref<1x8x32xbf16, #tpu.memory_space<vmem>>, %arg4: memref<1x32x8xbf16, #tpu.memory_space<vmem>>, %arg5: memref<1x8x32xbf16, #tpu.memory_space<vmem>>, %arg6: memref<32x32xbf16, #tpu.memory_space<vmem>>, %arg7: memref<1x32xf32, #tpu.memory_space<vmem>>, %arg8: memref<32x32xbf16, #tpu.memory_space<vmem>>, %arg9: memref<32x1xf32, #tpu.memory_space<vmem>>, %arg10: memref<32x32xbf16, #tpu.memory_space<vmem>>, %arg11: memref<1x32xf32, #tpu.memory_space<vmem>>, %arg12: memref<32x32xbf16, #tpu.memory_space<vmem>>, %arg13: memref<1x32xf32, #tpu.memory_space<vmem>>, %arg14: memref<1x8x32xf32, #tpu.memory_space<vmem>>, %arg15: memref<8x32xbf16, #tpu.memory_space<vmem>>, %arg16: memref<4x8x8xf32, #tpu.memory_space<vmem>>, %arg17: memref<8x32xf32, #tpu.memory_space<vmem>>) attributes {dimension_semantics = [#tpu.dimension_semantics<parallel>, #tpu.dimension_semantics<parallel>, #tpu.dimension_semantics<arbitrary>], iteration_bounds = array<i64: 2, 1, 1>, scalar_prefetch = 0 : i64, scratch_operands = 3 : i64, tpu.core_type = #tpu.core_type<tc>, window_params = [{transform_indices = @transform_0, window_bounds = array<i64: 1, 8, 32>}, {transform_indices = @transform_1, window_bounds = array<i64: 1, 32, 8>}, {transform_indices = @transform_2, window_bounds = array<i64: 1, 8, 32>}, {pipeline_mode = #tpu.pipeline_mode<synchronous>, transform_indices = @transform_3, window_bounds = array<i64: 32, 32>}, {pipeline_mode = #tpu.pipeline_mode<synchronous>, transform_indices = @transform_4, window_bounds = array<i64: 1, 32>}, {pipeline_mode = #tpu.pipeline_mode<synchronous>, transform_indices = @transform_5, window_bounds = array<i64: 32, 32>}, {pipeline_mode = #tpu.pipeline_mode<synchronous>, transform_indices = @transform_6, window_bounds = array<i64: 32, 1>}, {pipeline_mode = #tpu.pipeline_mode<synchronous>, transform_indices = @transform_7, window_bounds = array<i64: 32, 32>}, {pipeline_mode = #tpu.pipeline_mode<synchronous>, transform_indices = @transform_8, window_bounds = array<i64: 1, 32>}, {pipeline_mode = #tpu.pipeline_mode<synchronous>, transform_indices = @transform_9, window_bounds = array<i64: 32, 32>}, {pipeline_mode = #tpu.pipeline_mode<synchronous>, transform_indices = @transform_10, window_bounds = array<i64: 1, 32>}, {transform_indices = @transform_11, window_bounds = array<i64: 1, 8, 32>}]} {
    %c0_i32 = arith.constant 0 : i32
    %0 = arith.cmpi eq, %arg2, %c0_i32 : i32
    %1 = arith.extui %0 : i1 to i32
    %c0_i32_0 = arith.constant 0 : i32
    %2 = arith.cmpi ne, %1, %c0_i32_0 : i32
    scf.if %2 {
      %c0_104 = arith.constant 0 : index
      %c0_105 = arith.constant 0 : index
      %c0_106 = arith.constant 0 : index
      %127 = vector.load %arg3[%c0_104, %c0_105, %c0_106] : memref<1x8x32xbf16, #tpu.memory_space<vmem>>, vector<1x8x32xbf16>
      %128 = vector.shape_cast %127 : vector<1x8x32xbf16> to vector<8x32xbf16>
      %c0_107 = arith.constant 0 : index
      %c0_108 = arith.constant 0 : index
      %129 = vector.load %arg6[%c0_107, %c0_108] : memref<32x32xbf16, #tpu.memory_space<vmem>>, vector<32x32xbf16>
      %cst_109 = arith.constant dense<0.000000e+00> : vector<8x32xf32>
      %130 = tpu.matmul %128, %129, %cst_109 {dimension_numbers = #tpu.dot_dimension_numbers<[1], [0], [0], [1], [0, 0, 1, 1], [], []>} : vector<8x32xbf16>, vector<32x32xbf16>, vector<8x32xf32> -> vector<8x32xf32>
      %c0_110 = arith.constant 0 : index
      %c0_111 = arith.constant 0 : index
      %131 = vector.load %arg7[%c0_110, %c0_111] : memref<1x32xf32, #tpu.memory_space<vmem>>, vector<1x32xf32>
      %132 = vector.broadcast %131 : vector<1x32xf32> to vector<8x32xf32>
      %133 = arith.addf %130, %132 : vector<8x32xf32>
      %cst_112 = arith.constant 0.353553385 : f32
      %134 = vector.broadcast %cst_112 : f32 to vector<8x32xf32>
      %135 = arith.mulf %133, %134 : vector<8x32xf32>
      %136 = arith.truncf %135 : vector<8x32xf32> to vector<8x32xbf16>
      %c0_113 = arith.constant 0 : index
      %c0_114 = arith.constant 0 : index
      %137 = vector.load %arg15[%c0_113, %c0_114] : memref<8x32xbf16, #tpu.memory_space<vmem>>, vector<8x32xbf16>
      tpu.vector_store %arg15[%c0_113, %c0_114], %136 {strides = array<i32>} : memref<8x32xbf16, #tpu.memory_space<vmem>>, vector<8x32xbf16>,
      %cst_115 = arith.constant 0.000000e+00 : f32
      %138 = vector.broadcast %cst_115 : f32 to vector<8x32xf32>
      %c0_116 = arith.constant 0 : index
      %c0_117 = arith.constant 0 : index
      %139 = vector.load %arg17[%c0_116, %c0_117] : memref<8x32xf32, #tpu.memory_space<vmem>>, vector<8x32xf32>
      tpu.vector_store %arg17[%c0_116, %c0_117], %138 {strides = array<i32>} : memref<8x32xf32, #tpu.memory_space<vmem>>, vector<8x32xf32>,
    } else {
    }
    %c0 = arith.constant 0 : index
    %c0_1 = arith.constant 0 : index
    %c0_2 = arith.constant 0 : index
    %3 = vector.load %arg4[%c0, %c0_1, %c0_2] : memref<1x32x8xbf16, #tpu.memory_space<vmem>>, vector<1x32x8xbf16>
    %4 = vector.shape_cast %3 : vector<1x32x8xbf16> to vector<32x8xbf16>
    %c0_3 = arith.constant 0 : index
    %c0_4 = arith.constant 0 : index
    %c0_5 = arith.constant 0 : index
    %5 = vector.load %arg5[%c0_3, %c0_4, %c0_5] : memref<1x8x32xbf16, #tpu.memory_space<vmem>>, vector<1x8x32xbf16>
    %6 = vector.shape_cast %5 : vector<1x8x32xbf16> to vector<8x32xbf16>
    %c0_6 = arith.constant 0 : index
    %c0_7 = arith.constant 0 : index
    %7 = vector.load %arg8[%c0_6, %c0_7] : memref<32x32xbf16, #tpu.memory_space<vmem>>, vector<32x32xbf16>
    %cst = arith.constant dense<0.000000e+00> : vector<32x8xf32>
    %8 = tpu.matmul %7, %4, %cst {dimension_numbers = #tpu.dot_dimension_numbers<[1], [0], [0], [1], [0, 0, 1, 1], [], []>} : vector<32x32xbf16>, vector<32x8xbf16>, vector<32x8xf32> -> vector<32x8xf32>
    %c0_8 = arith.constant 0 : index
    %c0_9 = arith.constant 0 : index
    %9 = vector.load %arg9[%c0_8, %c0_9] : memref<32x1xf32, #tpu.memory_space<vmem>>, vector<32x1xf32>
    %10 = vector.broadcast %9 : vector<32x1xf32> to vector<32x8xf32>
    %11 = arith.addf %8, %10 : vector<32x8xf32>
    %12 = arith.truncf %11 : vector<32x8xf32> to vector<32x8xbf16>
    %c0_10 = arith.constant 0 : index
    %c0_11 = arith.constant 0 : index
    %13 = vector.load %arg10[%c0_10, %c0_11] : memref<32x32xbf16, #tpu.memory_space<vmem>>, vector<32x32xbf16>
    %cst_12 = arith.constant dense<0.000000e+00> : vector<8x32xf32>
    %14 = tpu.matmul %6, %13, %cst_12 {dimension_numbers = #tpu.dot_dimension_numbers<[1], [0], [0], [1], [0, 0, 1, 1], [], []>} : vector<8x32xbf16>, vector<32x32xbf16>, vector<8x32xf32> -> vector<8x32xf32>
    %c0_13 = arith.constant 0 : index
    %c0_14 = arith.constant 0 : index
    %15 = vector.load %arg11[%c0_13, %c0_14] : memref<1x32xf32, #tpu.memory_space<vmem>>, vector<1x32xf32>
    %16 = vector.broadcast %15 : vector<1x32xf32> to vector<8x32xf32>
    %17 = arith.addf %14, %16 : vector<8x32xf32>
    %18 = arith.truncf %17 : vector<8x32xf32> to vector<8x32xbf16>
    %c0_15 = arith.constant 0 : index
    %c0_16 = arith.constant 0 : index
    %19 = vector.load %arg15[%c0_15, %c0_16] : memref<8x32xbf16, #tpu.memory_space<vmem>>, vector<8x8xbf16>
    %20 = vector.extract_strided_slice %12 {offsets = [0, 0], sizes = [8, 8], strides = [1, 1]} : vector<32x8xbf16> to vector<8x8xbf16>
    %cst_17 = arith.constant dense<0.000000e+00> : vector<8x8xf32>
    %21 = tpu.matmul %19, %20, %cst_17 {dimension_numbers = #tpu.dot_dimension_numbers<[1], [0], [0], [1], [0, 0, 1, 1], [], []>} : vector<8x8xbf16>, vector<8x8xbf16>, vector<8x8xf32> -> vector<8x8xf32>
    %c0_18 = arith.constant 0 : index
    %c0_19 = arith.constant 0 : index
    %c0_20 = arith.constant 0 : index
    %22 = vector.load %arg16[%c0_18, %c0_19, %c0_20] : memref<4x8x8xf32, #tpu.memory_space<vmem>>, vector<1x8x8xf32>
    %23 = vector.shape_cast %22 : vector<1x8x8xf32> to vector<8x8xf32>
    %24 = vector.shape_cast %21 : vector<8x8xf32> to vector<1x8x8xf32>
    tpu.vector_store %arg16[%c0_18, %c0_19, %c0_20], %24 {strides = array<i32>} : memref<4x8x8xf32, #tpu.memory_space<vmem>>, vector<1x8x8xf32>,
    %c0_21 = arith.constant 0 : index
    %c8 = arith.constant 8 : index
    %25 = vector.load %arg15[%c0_21, %c8] : memref<8x32xbf16, #tpu.memory_space<vmem>>, vector<8x8xbf16>
    %26 = vector.extract_strided_slice %12 {offsets = [8, 0], sizes = [8, 8], strides = [1, 1]} : vector<32x8xbf16> to vector<8x8xbf16>
    %cst_22 = arith.constant dense<0.000000e+00> : vector<8x8xf32>
    %27 = tpu.matmul %25, %26, %cst_22 {dimension_numbers = #tpu.dot_dimension_numbers<[1], [0], [0], [1], [0, 0, 1, 1], [], []>} : vector<8x8xbf16>, vector<8x8xbf16>, vector<8x8xf32> -> vector<8x8xf32>
    %c1 = arith.constant 1 : index
    %c0_23 = arith.constant 0 : index
    %c0_24 = arith.constant 0 : index
    %28 = vector.load %arg16[%c1, %c0_23, %c0_24] : memref<4x8x8xf32, #tpu.memory_space<vmem>>, vector<1x8x8xf32>
    %29 = vector.shape_cast %28 : vector<1x8x8xf32> to vector<8x8xf32>
    %30 = vector.shape_cast %27 : vector<8x8xf32> to vector<1x8x8xf32>
    tpu.vector_store %arg16[%c1, %c0_23, %c0_24], %30 {strides = array<i32>} : memref<4x8x8xf32, #tpu.memory_space<vmem>>, vector<1x8x8xf32>,
    %c0_25 = arith.constant 0 : index
    %c16 = arith.constant 16 : index
    %31 = vector.load %arg15[%c0_25, %c16] : memref<8x32xbf16, #tpu.memory_space<vmem>>, vector<8x8xbf16>
    %32 = vector.extract_strided_slice %12 {offsets = [16, 0], sizes = [8, 8], strides = [1, 1]} : vector<32x8xbf16> to vector<8x8xbf16>
    %cst_26 = arith.constant dense<0.000000e+00> : vector<8x8xf32>
    %33 = tpu.matmul %31, %32, %cst_26 {dimension_numbers = #tpu.dot_dimension_numbers<[1], [0], [0], [1], [0, 0, 1, 1], [], []>} : vector<8x8xbf16>, vector<8x8xbf16>, vector<8x8xf32> -> vector<8x8xf32>
    %c2 = arith.constant 2 : index
    %c0_27 = arith.constant 0 : index
    %c0_28 = arith.constant 0 : index
    %34 = vector.load %arg16[%c2, %c0_27, %c0_28] : memref<4x8x8xf32, #tpu.memory_space<vmem>>, vector<1x8x8xf32>
    %35 = vector.shape_cast %34 : vector<1x8x8xf32> to vector<8x8xf32>
    %36 = vector.shape_cast %33 : vector<8x8xf32> to vector<1x8x8xf32>
    tpu.vector_store %arg16[%c2, %c0_27, %c0_28], %36 {strides = array<i32>} : memref<4x8x8xf32, #tpu.memory_space<vmem>>, vector<1x8x8xf32>,
    %c0_29 = arith.constant 0 : index
    %c24 = arith.constant 24 : index
    %37 = vector.load %arg15[%c0_29, %c24] : memref<8x32xbf16, #tpu.memory_space<vmem>>, vector<8x8xbf16>
    %38 = vector.extract_strided_slice %12 {offsets = [24, 0], sizes = [8, 8], strides = [1, 1]} : vector<32x8xbf16> to vector<8x8xbf16>
    %cst_30 = arith.constant dense<0.000000e+00> : vector<8x8xf32>
    %39 = tpu.matmul %37, %38, %cst_30 {dimension_numbers = #tpu.dot_dimension_numbers<[1], [0], [0], [1], [0, 0, 1, 1], [], []>} : vector<8x8xbf16>, vector<8x8xbf16>, vector<8x8xf32> -> vector<8x8xf32>
    %c3 = arith.constant 3 : index
    %c0_31 = arith.constant 0 : index
    %c0_32 = arith.constant 0 : index
    %40 = vector.load %arg16[%c3, %c0_31, %c0_32] : memref<4x8x8xf32, #tpu.memory_space<vmem>>, vector<1x8x8xf32>
    %41 = vector.shape_cast %40 : vector<1x8x8xf32> to vector<8x8xf32>
    %42 = vector.shape_cast %39 : vector<8x8xf32> to vector<1x8x8xf32>
    tpu.vector_store %arg16[%c3, %c0_31, %c0_32], %42 {strides = array<i32>} : memref<4x8x8xf32, #tpu.memory_space<vmem>>, vector<1x8x8xf32>,
    %c0_33 = arith.constant 0 : index
    %c0_34 = arith.constant 0 : index
    %c0_35 = arith.constant 0 : index
    %43 = vector.load %arg16[%c0_33, %c0_34, %c0_35] : memref<4x8x8xf32, #tpu.memory_space<vmem>>, vector<1x8x8xf32>
    %44 = vector.shape_cast %43 : vector<1x8x8xf32> to vector<8x8xf32>
    %c1_36 = arith.constant 1 : index
    %c0_37 = arith.constant 0 : index
    %c0_38 = arith.constant 0 : index
    %45 = vector.load %arg16[%c1_36, %c0_37, %c0_38] : memref<4x8x8xf32, #tpu.memory_space<vmem>>, vector<1x8x8xf32>
    %46 = vector.shape_cast %45 : vector<1x8x8xf32> to vector<8x8xf32>
    %47 = arith.maximumf %44, %46 : vector<8x8xf32>
    %c2_39 = arith.constant 2 : index
    %c0_40 = arith.constant 0 : index
    %c0_41 = arith.constant 0 : index
    %48 = vector.load %arg16[%c2_39, %c0_40, %c0_41] : memref<4x8x8xf32, #tpu.memory_space<vmem>>, vector<1x8x8xf32>
    %49 = vector.shape_cast %48 : vector<1x8x8xf32> to vector<8x8xf32>
    %50 = arith.maximumf %47, %49 : vector<8x8xf32>
    %c3_42 = arith.constant 3 : index
    %c0_43 = arith.constant 0 : index
    %c0_44 = arith.constant 0 : index
    %51 = vector.load %arg16[%c3_42, %c0_43, %c0_44] : memref<4x8x8xf32, #tpu.memory_space<vmem>>, vector<1x8x8xf32>
    %52 = vector.shape_cast %51 : vector<1x8x8xf32> to vector<8x8xf32>
    %53 = arith.maximumf %50, %52 : vector<8x8xf32>
    %cst_45 = arith.constant 0.000000e+00 : f32
    %54 = vector.broadcast %cst_45 : f32 to vector<8x8xf32>
    %c0_46 = arith.constant 0 : index
    %c0_47 = arith.constant 0 : index
    %c0_48 = arith.constant 0 : index
    %55 = vector.load %arg16[%c0_46, %c0_47, %c0_48] : memref<4x8x8xf32, #tpu.memory_space<vmem>>, vector<1x8x8xf32>
    %56 = vector.shape_cast %55 : vector<1x8x8xf32> to vector<8x8xf32>
    %57 = arith.subf %56, %53 : vector<8x8xf32>
    %58 = math.exp %57 : vector<8x8xf32>
    %c0_49 = arith.constant 0 : index
    %c0_50 = arith.constant 0 : index
    %c0_51 = arith.constant 0 : index
    %59 = vector.load %arg16[%c0_49, %c0_50, %c0_51] : memref<4x8x8xf32, #tpu.memory_space<vmem>>, vector<1x8x8xf32>
    %60 = vector.shape_cast %59 : vector<1x8x8xf32> to vector<8x8xf32>
    %61 = vector.shape_cast %58 : vector<8x8xf32> to vector<1x8x8xf32>
    tpu.vector_store %arg16[%c0_49, %c0_50, %c0_51], %61 {strides = array<i32>} : memref<4x8x8xf32, #tpu.memory_space<vmem>>, vector<1x8x8xf32>,
    %62 = arith.addf %54, %58 : vector<8x8xf32>
    %c1_52 = arith.constant 1 : index
    %c0_53 = arith.constant 0 : index
    %c0_54 = arith.constant 0 : index
    %63 = vector.load %arg16[%c1_52, %c0_53, %c0_54] : memref<4x8x8xf32, #tpu.memory_space<vmem>>, vector<1x8x8xf32>
    %64 = vector.shape_cast %63 : vector<1x8x8xf32> to vector<8x8xf32>
    %65 = arith.subf %64, %53 : vector<8x8xf32>
    %66 = math.exp %65 : vector<8x8xf32>
    %c1_55 = arith.constant 1 : index
    %c0_56 = arith.constant 0 : index
    %c0_57 = arith.constant 0 : index
    %67 = vector.load %arg16[%c1_55, %c0_56, %c0_57] : memref<4x8x8xf32, #tpu.memory_space<vmem>>, vector<1x8x8xf32>
    %68 = vector.shape_cast %67 : vector<1x8x8xf32> to vector<8x8xf32>
    %69 = vector.shape_cast %66 : vector<8x8xf32> to vector<1x8x8xf32>
    tpu.vector_store %arg16[%c1_55, %c0_56, %c0_57], %69 {strides = array<i32>} : memref<4x8x8xf32, #tpu.memory_space<vmem>>, vector<1x8x8xf32>,
    %70 = arith.addf %62, %66 : vector<8x8xf32>
    %c2_58 = arith.constant 2 : index
    %c0_59 = arith.constant 0 : index
    %c0_60 = arith.constant 0 : index
    %71 = vector.load %arg16[%c2_58, %c0_59, %c0_60] : memref<4x8x8xf32, #tpu.memory_space<vmem>>, vector<1x8x8xf32>
    %72 = vector.shape_cast %71 : vector<1x8x8xf32> to vector<8x8xf32>
    %73 = arith.subf %72, %53 : vector<8x8xf32>
    %74 = math.exp %73 : vector<8x8xf32>
    %c2_61 = arith.constant 2 : index
    %c0_62 = arith.constant 0 : index
    %c0_63 = arith.constant 0 : index
    %75 = vector.load %arg16[%c2_61, %c0_62, %c0_63] : memref<4x8x8xf32, #tpu.memory_space<vmem>>, vector<1x8x8xf32>
    %76 = vector.shape_cast %75 : vector<1x8x8xf32> to vector<8x8xf32>
    %77 = vector.shape_cast %74 : vector<8x8xf32> to vector<1x8x8xf32>
    tpu.vector_store %arg16[%c2_61, %c0_62, %c0_63], %77 {strides = array<i32>} : memref<4x8x8xf32, #tpu.memory_space<vmem>>, vector<1x8x8xf32>,
    %78 = arith.addf %70, %74 : vector<8x8xf32>
    %c3_64 = arith.constant 3 : index
    %c0_65 = arith.constant 0 : index
    %c0_66 = arith.constant 0 : index
    %79 = vector.load %arg16[%c3_64, %c0_65, %c0_66] : memref<4x8x8xf32, #tpu.memory_space<vmem>>, vector<1x8x8xf32>
    %80 = vector.shape_cast %79 : vector<1x8x8xf32> to vector<8x8xf32>
    %81 = arith.subf %80, %53 : vector<8x8xf32>
    %82 = math.exp %81 : vector<8x8xf32>
    %c3_67 = arith.constant 3 : index
    %c0_68 = arith.constant 0 : index
    %c0_69 = arith.constant 0 : index
    %83 = vector.load %arg16[%c3_67, %c0_68, %c0_69] : memref<4x8x8xf32, #tpu.memory_space<vmem>>, vector<1x8x8xf32>
    %84 = vector.shape_cast %83 : vector<1x8x8xf32> to vector<8x8xf32>
    %85 = vector.shape_cast %82 : vector<8x8xf32> to vector<1x8x8xf32>
    tpu.vector_store %arg16[%c3_67, %c0_68, %c0_69], %85 {strides = array<i32>} : memref<4x8x8xf32, #tpu.memory_space<vmem>>, vector<1x8x8xf32>,
    %86 = arith.addf %78, %82 : vector<8x8xf32>
    %87 = tpu.reciprocal %86 {approx = true} : vector<8x8xf32> -> vector<8x8xf32>
    %c0_70 = arith.constant 0 : index
    %c0_71 = arith.constant 0 : index
    %c0_72 = arith.constant 0 : index
    %88 = vector.load %arg16[%c0_70, %c0_71, %c0_72] : memref<4x8x8xf32, #tpu.memory_space<vmem>>, vector<1x8x8xf32>
    %89 = vector.shape_cast %88 : vector<1x8x8xf32> to vector<8x8xf32>
    %90 = arith.mulf %89, %87 : vector<8x8xf32>
    %91 = arith.truncf %90 : vector<8x8xf32> to vector<8x8xbf16>
    %92 = vector.extract_strided_slice %18 {offsets = [0, 0], sizes = [8, 8], strides = [1, 1]} : vector<8x32xbf16> to vector<8x8xbf16>
    %c0_73 = arith.constant 0 : index
    %c0_74 = arith.constant 0 : index
    %93 = vector.load %arg17[%c0_73, %c0_74] : memref<8x32xf32, #tpu.memory_space<vmem>>, vector<8x8xf32>
    %cst_75 = arith.constant dense<0.000000e+00> : vector<8x8xf32>
    %94 = tpu.matmul %91, %92, %cst_75 {dimension_numbers = #tpu.dot_dimension_numbers<[1], [0], [0], [1], [0, 0, 1, 1], [], []>} : vector<8x8xbf16>, vector<8x8xbf16>, vector<8x8xf32> -> vector<8x8xf32>
    %95 = arith.addf %93, %94 : vector<8x8xf32>
    %c0_76 = arith.constant 0 : index
    %c0_77 = arith.constant 0 : index
    %96 = vector.load %arg17[%c0_76, %c0_77] : memref<8x32xf32, #tpu.memory_space<vmem>>, vector<8x8xf32>
    tpu.vector_store %arg17[%c0_76, %c0_77], %95 {strides = array<i32>} : memref<8x32xf32, #tpu.memory_space<vmem>>, vector<8x8xf32>,
    %c1_78 = arith.constant 1 : index
    %c0_79 = arith.constant 0 : index
    %c0_80 = arith.constant 0 : index
    %97 = vector.load %arg16[%c1_78, %c0_79, %c0_80] : memref<4x8x8xf32, #tpu.memory_space<vmem>>, vector<1x8x8xf32>
    %98 = vector.shape_cast %97 : vector<1x8x8xf32> to vector<8x8xf32>
    %99 = arith.mulf %98, %87 : vector<8x8xf32>
    %100 = arith.truncf %99 : vector<8x8xf32> to vector<8x8xbf16>
    %101 = vector.extract_strided_slice %18 {offsets = [0, 8], sizes = [8, 8], strides = [1, 1]} : vector<8x32xbf16> to vector<8x8xbf16>
    %c0_81 = arith.constant 0 : index
    %c8_82 = arith.constant 8 : index
    %102 = vector.load %arg17[%c0_81, %c8_82] : memref<8x32xf32, #tpu.memory_space<vmem>>, vector<8x8xf32>
    %cst_83 = arith.constant dense<0.000000e+00> : vector<8x8xf32>
    %103 = tpu.matmul %100, %101, %cst_83 {dimension_numbers = #tpu.dot_dimension_numbers<[1], [0], [0], [1], [0, 0, 1, 1], [], []>} : vector<8x8xbf16>, vector<8x8xbf16>, vector<8x8xf32> -> vector<8x8xf32>
    %104 = arith.addf %102, %103 : vector<8x8xf32>
    %c0_84 = arith.constant 0 : index
    %c8_85 = arith.constant 8 : index
    %105 = vector.load %arg17[%c0_84, %c8_85] : memref<8x32xf32, #tpu.memory_space<vmem>>, vector<8x8xf32>
    tpu.vector_store %arg17[%c0_84, %c8_85], %104 {strides = array<i32>} : memref<8x32xf32, #tpu.memory_space<vmem>>, vector<8x8xf32>,
    %c2_86 = arith.constant 2 : index
    %c0_87 = arith.constant 0 : index
    %c0_88 = arith.constant 0 : index
    %106 = vector.load %arg16[%c2_86, %c0_87, %c0_88] : memref<4x8x8xf32, #tpu.memory_space<vmem>>, vector<1x8x8xf32>
    %107 = vector.shape_cast %106 : vector<1x8x8xf32> to vector<8x8xf32>
    %108 = arith.mulf %107, %87 : vector<8x8xf32>
    %109 = arith.truncf %108 : vector<8x8xf32> to vector<8x8xbf16>
    %110 = vector.extract_strided_slice %18 {offsets = [0, 16], sizes = [8, 8], strides = [1, 1]} : vector<8x32xbf16> to vector<8x8xbf16>
    %c0_89 = arith.constant 0 : index
    %c16_90 = arith.constant 16 : index
    %111 = vector.load %arg17[%c0_89, %c16_90] : memref<8x32xf32, #tpu.memory_space<vmem>>, vector<8x8xf32>
    %cst_91 = arith.constant dense<0.000000e+00> : vector<8x8xf32>
    %112 = tpu.matmul %109, %110, %cst_91 {dimension_numbers = #tpu.dot_dimension_numbers<[1], [0], [0], [1], [0, 0, 1, 1], [], []>} : vector<8x8xbf16>, vector<8x8xbf16>, vector<8x8xf32> -> vector<8x8xf32>
    %113 = arith.addf %111, %112 : vector<8x8xf32>
    %c0_92 = arith.constant 0 : index
    %c16_93 = arith.constant 16 : index
    %114 = vector.load %arg17[%c0_92, %c16_93] : memref<8x32xf32, #tpu.memory_space<vmem>>, vector<8x8xf32>
    tpu.vector_store %arg17[%c0_92, %c16_93], %113 {strides = array<i32>} : memref<8x32xf32, #tpu.memory_space<vmem>>, vector<8x8xf32>,
    %c3_94 = arith.constant 3 : index
    %c0_95 = arith.constant 0 : index
    %c0_96 = arith.constant 0 : index
    %115 = vector.load %arg16[%c3_94, %c0_95, %c0_96] : memref<4x8x8xf32, #tpu.memory_space<vmem>>, vector<1x8x8xf32>
    %116 = vector.shape_cast %115 : vector<1x8x8xf32> to vector<8x8xf32>
    %117 = arith.mulf %116, %87 : vector<8x8xf32>
    %118 = arith.truncf %117 : vector<8x8xf32> to vector<8x8xbf16>
    %119 = vector.extract_strided_slice %18 {offsets = [0, 24], sizes = [8, 8], strides = [1, 1]} : vector<8x32xbf16> to vector<8x8xbf16>
    %c0_97 = arith.constant 0 : index
    %c24_98 = arith.constant 24 : index
    %120 = vector.load %arg17[%c0_97, %c24_98] : memref<8x32xf32, #tpu.memory_space<vmem>>, vector<8x8xf32>
    %cst_99 = arith.constant dense<0.000000e+00> : vector<8x8xf32>
    %121 = tpu.matmul %118, %119, %cst_99 {dimension_numbers = #tpu.dot_dimension_numbers<[1], [0], [0], [1], [0, 0, 1, 1], [], []>} : vector<8x8xbf16>, vector<8x8xbf16>, vector<8x8xf32> -> vector<8x8xf32>
    %122 = arith.addf %120, %121 : vector<8x8xf32>
    %c0_100 = arith.constant 0 : index
    %c24_101 = arith.constant 24 : index
    %123 = vector.load %arg17[%c0_100, %c24_101] : memref<8x32xf32, #tpu.memory_space<vmem>>, vector<8x8xf32>
    tpu.vector_store %arg17[%c0_100, %c24_101], %122 {strides = array<i32>} : memref<8x32xf32, #tpu.memory_space<vmem>>, vector<8x8xf32>,
    %c0_i32_102 = arith.constant 0 : i32
    %124 = arith.cmpi eq, %arg2, %c0_i32_102 : i32
    %125 = arith.extui %124 : i1 to i32
    %c0_i32_103 = arith.constant 0 : i32
    %126 = arith.cmpi ne, %125, %c0_i32_103 : i32
    scf.if %126 {
      %c0_104 = arith.constant 0 : index
      %c0_105 = arith.constant 0 : index
      %127 = vector.load %arg17[%c0_104, %c0_105] : memref<8x32xf32, #tpu.memory_space<vmem>>, vector<8x32xf32>
      %128 = arith.truncf %127 : vector<8x32xf32> to vector<8x32xbf16>
      %c0_106 = arith.constant 0 : index
      %c0_107 = arith.constant 0 : index
      %129 = vector.load %arg12[%c0_106, %c0_107] : memref<32x32xbf16, #tpu.memory_space<vmem>>, vector<32x32xbf16>
      %cst_108 = arith.constant dense<0.000000e+00> : vector<8x32xf32>
      %130 = tpu.matmul %128, %129, %cst_108 {dimension_numbers = #tpu.dot_dimension_numbers<[1], [0], [0], [1], [0, 0, 1, 1], [], []>} : vector<8x32xbf16>, vector<32x32xbf16>, vector<8x32xf32> -> vector<8x32xf32>
      %c0_109 = arith.constant 0 : index
      %c0_110 = arith.constant 0 : index
      %131 = vector.load %arg13[%c0_109, %c0_110] : memref<1x32xf32, #tpu.memory_space<vmem>>, vector<1x32xf32>
      %132 = vector.broadcast %131 : vector<1x32xf32> to vector<8x32xf32>
      %133 = arith.addf %130, %132 : vector<8x32xf32>
      %c0_111 = arith.constant 0 : index
      %c0_112 = arith.constant 0 : index
      %c0_113 = arith.constant 0 : index
      %134 = vector.load %arg14[%c0_111, %c0_112, %c0_113] : memref<1x8x32xf32, #tpu.memory_space<vmem>>, vector<1x8x32xf32>
      %135 = vector.shape_cast %134 : vector<1x8x32xf32> to vector<8x32xf32>
      %136 = vector.shape_cast %133 : vector<8x32xf32> to vector<1x8x32xf32>
      tpu.vector_store %arg14[%c0_111, %c0_112, %c0_113], %136 {strides = array<i32>} : memref<1x8x32xf32, #tpu.memory_space<vmem>>, vector<1x8x32xf32>,
    } else {
    }
    return
  }
  func.func @transform_0(%arg0: i32, %arg1: i32, %arg2: i32) -> (i32, i32, i32) {
    %c0_i32 = arith.constant 0 : i32
    %c0_i32_0 = arith.constant 0 : i32
    return %arg0, %arg1, %c0_i32 : i32, i32, i32
  }
  func.func @transform_1(%arg0: i32, %arg1: i32, %arg2: i32) -> (i32, i32, i32) {
    %c0_i32 = arith.constant 0 : i32
    %c0_i32_0 = arith.constant 0 : i32
    return %arg0, %c0_i32, %arg2 : i32, i32, i32
  }
  func.func @transform_2(%arg0: i32, %arg1: i32, %arg2: i32) -> (i32, i32, i32) {
    %c0_i32 = arith.constant 0 : i32
    %c0_i32_0 = arith.constant 0 : i32
    return %arg0, %arg2, %c0_i32 : i32, i32, i32
  }
  func.func @transform_3(%arg0: i32, %arg1: i32, %arg2: i32) -> (i32, i32) {
    %c0_i32 = arith.constant 0 : i32
    %c0_i32_0 = arith.constant 0 : i32
    %c0_i32_1 = arith.constant 0 : i32
    return %c0_i32, %c0_i32_0 : i32, i32
  }
  func.func @transform_4(%arg0: i32, %arg1: i32, %arg2: i32) -> (i32, i32) {
    %c0_i32 = arith.constant 0 : i32
    %c0_i32_0 = arith.constant 0 : i32
    %c0_i32_1 = arith.constant 0 : i32
    return %c0_i32, %c0_i32_0 : i32, i32
  }
  func.func @transform_5(%arg0: i32, %arg1: i32, %arg2: i32) -> (i32, i32) {
    %c0_i32 = arith.constant 0 : i32
    %c0_i32_0 = arith.constant 0 : i32
    %c0_i32_1 = arith.constant 0 : i32
    return %c0_i32, %c0_i32_0 : i32, i32
  }
  func.func @transform_6(%arg0: i32, %arg1: i32, %arg2: i32) -> (i32, i32) {
    %c0_i32 = arith.constant 0 : i32
    %c0_i32_0 = arith.constant 0 : i32
    %c0_i32_1 = arith.constant 0 : i32
    return %c0_i32, %c0_i32_0 : i32, i32
  }
  func.func @transform_7(%arg0: i32, %arg1: i32, %arg2: i32) -> (i32, i32) {
    %c0_i32 = arith.constant 0 : i32
    %c0_i32_0 = arith.constant 0 : i32
    %c0_i32_1 = arith.constant 0 : i32
    return %c0_i32, %c0_i32_0 : i32, i32
  }
  func.func @transform_8(%arg0: i32, %arg1: i32, %arg2: i32) -> (i32, i32) {
    %c0_i32 = arith.constant 0 : i32
    %c0_i32_0 = arith.constant 0 : i32
    %c0_i32_1 = arith.constant 0 : i32
    return %c0_i32, %c0_i32_0 : i32, i32
  }
  func.func @transform_9(%arg0: i32, %arg1: i32, %arg2: i32) -> (i32, i32) {
    %c0_i32 = arith.constant 0 : i32
    %c0_i32_0 = arith.constant 0 : i32
    %c0_i32_1 = arith.constant 0 : i32
    return %c0_i32, %c0_i32_0 : i32, i32
  }
  func.func @transform_10(%arg0: i32, %arg1: i32, %arg2: i32) -> (i32, i32) {
    %c0_i32 = arith.constant 0 : i32
    %c0_i32_0 = arith.constant 0 : i32
    %c0_i32_1 = arith.constant 0 : i32
    return %c0_i32, %c0_i32_0 : i32, i32
  }
  func.func @transform_11(%arg0: i32, %arg1: i32, %arg2: i32) -> (i32, i32, i32) {
    %c0_i32 = arith.constant 0 : i32
    %c0_i32_0 = arith.constant 0 : i32
    return %arg0, %arg1, %c0_i32 : i32, i32, i32
  }
}

</mosaic_0001>

<bundles_post_ra>
// kernel: tpu_custom_call.1
= control target key start
LH: loop header
LB: loop body
LE: loop exit
PB: predicated region body
PF: predicated region fallthrough
CT: control target
= control target key end

     0   :  { %s1649_s0 = inlined_call_operand.vmem [shape: bf16[2,8,32], index: 0, kind: input, shape index: {}]   ;;  %s1650_s1 = inlined_call_operand.vmem [shape: bf16[2,32,8], index: 1, kind: input, shape index: {}]   ;;  %s1651_s2 = inlined_call_operand.hbm [shape: bf16[2,8,32], index: 2, kind: input, shape index: {}]   ;;  %s1652_s3 = inlined_call_operand.vmem [shape: bf16[32,32], index: 3, kind: input, shape index: {}]   ;;  %s1653_s4 = inlined_call_operand.vmem [shape: f32[1,32], index: 4, kind: input, shape index: {}]   ;;  %s1654_s5 = inlined_call_operand.vmem [shape: bf16[32,32], index: 5, kind: input, shape index: {}]   ;;  %s1655_s6 = inlined_call_operand.vmem [shape: f32[32,1], index: 6, kind: input, shape index: {}]   ;;  %s1656_s7 = inlined_call_operand.vmem [shape: bf16[32,32], index: 7, kind: input, shape index: {}]   ;;  %s1657_s8 = inlined_call_operand.vmem [shape: f32[1,32], index: 8, kind: input, shape index: {}]   ;;  %s1658_s9 = inlined_call_operand.vmem [shape: bf16[32,32], index: 9, kind: input, shape index: {}]   ;;  %s1659_s10 = inlined_call_operand.vmem [shape: f32[1,32], index: 10, kind: input, shape index: {}]   ;;  %s1660_s11 = inlined_call_operand.hbm [shape: f32[2,8,32], index: 11, kind: output, shape index: {}]  }
   0x1   :  { %1666 = sst [smem:[#allocation15_spill]] %s1651_s2 }
   0x2   :  { %1667 = sst [smem:[#allocation16_spill]] %s1659_s10 }
   0x3   :  { %16 = vsyncpa [#allocation6], 0 }
   0x4   :  { %18 = vsyncpa [#allocation6 + $0x1], 0 }
   0x5   :  { %19 = vsyncpa [#allocation7], 0 }
   0x6   :  { %21 = vsyncpa [#allocation7 + $0x1], 0  ;;  %s1438_s17 = smov 0   ;;  %s1440_s18 = smov 0  }
   0x7   :  { %s1442_s19 = smov 0   ;;  %s1444_s20 = smov 0  }
   0x8   :  { %s1446_s21 = smov 0   ;;  %s1448_s22 = smov 0  }
   0x9 LB: > { %1668 = sst [smem:[#allocation11_spill]] %s1348_s17  ;;  %s1091_s23 = sadd.s32 4294967295, %s1368_s22   ;;  %s1368_s22 = sphi %s1448_s22, %s27_s22   ;;  %s1364_s21 = sphi %s1446_s21, %s1681_s21   ;;  %s1360_s20 = sphi %s1444_s20, %s1680_s20   ;;  %s1356_s19 = sphi %s1442_s19, %s1684_s19   ;;  %s1352_s18 = sphi %s1440_s18, %s1683_s18   ;;  %s1348_s17 = sphi %s1438_s17, %s1682_s17  }
   0xa   : > { %1669 = sst [smem:[#allocation12_spill]] %s1364_s21  ;;  %s1092_s24 = sadd.s32 4294967294, %s1368_s22  }
   0xb   : > { %s46_s25 = sadd.s32 1, %s1364_s21  ;;  %s111_s26 = sadd.s32 1, %s1356_s19 }
   0xc   : > { %p48_p0 = scmp.ge.s32.totalorder %s46_s25, 2  ;;  %p118_p1 = scmp.ne.s32.totalorder %s1356_s19, %s1352_s18 }
   0xd   : > { %p119_p2 = scmp.eq.s32.totalorder %s1368_s22, 0  ;;  %p124_p3 = scmp.ne.s32.totalorder %s1352_s18, %s1348_s17 }
   0xe   : > { %s1686_s25 = smov (%p48_p0, %s46_s25), 0  ;;  %p125_p5 = scmp.eq.s32.totalorder %s1091_s23, 0 }
   0xf   : > { %1670 = sst [smem:[#allocation13_spill]] %s1686_s25  ;;  %p1479_p4 = por %p119_p2, %p118_p1 }
  0x10   : > { %s106_s28 = ssub.s32 %s1364_s21, %s1686_s25  ;;  %p318_p6 = scmp.eq.s32.totalorder %s1091_s23, 1 }
  0x11   : > { %p109_p7 = scmp.eq.s32.totalorder %s106_s28, 0  ;;  %p1485_p8 = por %p125_p5, %p124_p3 }
  0x12   : > { %p1489_p9 = por %p318_p6, %p118_p1  ;;  %p324_p10 = scmp.eq.s32.totalorder %s1092_s24, 1 }
  0x13   : > { %s1494_s12 = scalar_select %p109_p7, %s1356_s19, %s111_s26  }
  0x14   : > { %s1673_s30 = scalar_select %p1489_p9, 1, 0 }
  0x15   : > { %p1496_p11 = por %p324_p10, %p124_p3  ;;  %p1094_p12 = scmp.ge.s32.totalorder %s1368_s22, 2 }
  0x16   : > { %1674 = sst [smem:[#allocation14_spill]] %s1673_s30  ;;  %p1183_p13 = scmp.lt.s32.totalorder %s1368_s22, 2 }
  0x17   : > { %s389_s14 = sand.u32 1, %s1356_s19   ;;  %s1096_s16 = sshll.u32 %s1364_s21, 2 }
  0x18   : > { %s1095_s15 = sshll.u32 %s389_s14, 2  ;;  %s1676_s2 = sld [smem:[#allocation15_spill]] }
  0x19   : > { %s393_s17 = scalar_lea.vmem [#allocation5], %s1095_s15  ;;  %p1176_p0 = pnand %p1183_p13, %p1479_p4 }
  0x1a   : > { %s402_s10 = sshll.u32 %s393_s17, 4  ;;  %p1097_p1 = scmp.ge.s32.totalorder %s1368_s22, 1  ;;  %s403_s10 = int_to_ptr.vmem [resolvable:$true] %s402_s10 }
  0x1b   : > { %p407_p2 = scmp.lt.s32.totalorder %s1368_s22, 3  ;;  %s390_s24 = scalar_lea.sflag [#allocation6], %s389_s14 }
  0x1d   : > { %p408_p3 = pnand %p1097_p1, %p407_p2 }
  0x1e   : > { %s398_s25 = scalar_lea.hbm %s1676_s2, %s1096_s16  ;;  %s1512_s26 = sand.u32 (!%p408_p3), 1, %s1352_s18  }
  0x1f   : > { %s400_s30 = sshll.u32 %s398_s25, 4  ;;  %411 = sbr.rel (%p408_p3) target bundleno = 886 (0x376), region = 64  ;;  %s401_s30 = int_to_ptr.hbm [resolvable:$true] %s400_s30 }
  0x20   : > { %1178 = dma.hbm_to_vmem [thread:$0]  (!%p1176_p0), %s401_s30, 64, %s403_s10, %s390_s24  }
  0x21   : > { %s1098_s16 = sshll.u32 (!%p408_p3), %s1512_s26, 2  ;;  %s414_s15 = scalar_lea.sflag (!%p408_p3), [#allocation6], %s1512_s26 }
  0x22   : > { %s1516_s17 = scalar_lea.vmem (!%p408_p3), [#allocation5], %s1098_s16 }
  0x24   : > { %1339 = dma.done.wait (%p1485_p8), %s414_s15, 64  }
  0x25   : > { %1341 = vsyncadd (%p1485_p8), %s414_s15, 4294967232  ;;  %p472_p4 = scmp.lt.s32.totalorder %s1360_s20, 1  ;;  %v1370_v0 = vmov 0   ;;  %v1162_v1 = vld [vmem:[%s1652_s3 + $0x8] sm:$0xff]  ;;  %v1161_v3 = vld [vmem:[%s1652_s3] sm:$0xff]  ;;  %vm513_vm0 = vcmask 261120  }
  0x26   : > { %1241 = vset.pattern.permute.xlu0 %v1370_v0  ;;  %1242 = vset.pattern.permute.xlu1 %v1370_v0  ;;  %v544_v5 = vld [vmem:[%s1655_s6] sm:$0xff]  ;;  %v547_v6 = vld [vmem:[%s1655_s6 + $0x18] sm:$0xff]  ;;  %v545_v9 = vld [vmem:[%s1655_s6 + $0x8] sm:$0xff]  ;;  %vm662_vm1 = vcmask 1043456   ;;  %vm532_vm2 = vcmask 257024   ;;  %vm658_vm3 = vcmask 64512  }
  0x27   : > { %s473_s10 = scalar_select %p472_p4, %s1360_s20, 1  ;;  %523 = vmatpush.bf16.msra.mxu0 %v1162_v1  ;;  %550 = vperm.xlu0 %1241, %v544_v5   ;;  %v1165_v7 = vld [vmem:[%s1654_s5] sm:$0xff]  ;;  %v546_v10 = vld [vmem:[%s1655_s6 + $0x10] sm:$0xff]  ;;  %v1166_v11 = vld [vmem:[%s1654_s5 + $0x8] sm:$0xff]  ;;  %vm850_vm4 = vcmask 130112   ;;  %vm882_vm5 = vcmask 195712  }
  0x28   : > { %565 = vperm.xlu1 %1242, %v547_v6   ;;  %v1168_v12 = vld [vmem:[%s1656_s7 + $0x8] sm:$0xff]  ;;  %v1167_v13 = vld [vmem:[%s1656_s7] sm:$0xff]  ;;  %s1372_s28 = smov 120   ;;  %s1373_s2 = smov 104   ;;  %vm914_vm6 = vcmask 261312  }
  0x29   : > { %s1160_s25 = sshll.u32 %s473_s10, 4  ;;  %s1100_s24 = sshll.u32 %s473_s10, 2  ;;  %649 = vmatpush.bf16.msra.mxu2 %v1168_v12  ;;  %v539_v14 = vld [vmem:[%s1516_s17] sm:$0xf]  ;;  %v1243_v15 = vld [vmem:[%s1653_s4] ss:$0 sm:$0xff] }
  0x2a   : > { %s486_s14 = scalar_lea.vmem %s1650_s1, %s1160_s25  ;;  %s478_s25 = scalar_lea.vmem %s1649_s0, %s1100_s24  ;;  %v1244_v52 = vld [vmem:[%s1657_s8] ss:$0 sm:$0xff] }
  0x2b   : > { %v1164_v2 = vld [vmem:[%s486_s14 + $0x8] sm:$0xff]  ;;  %v1163_v4 = vld [vmem:[%s486_s14] sm:$0xff]  ;;  %524 = vmatpush.bf16.msra.mxu0 %v1161_v3  ;;  %s1371_s17 = smov 112   ;;  %s1375_s24 = smov 8  }
  0x2c   : > { %603 = vmatpush.bf16.msra.mxu1 %v1164_v2  ;;  %v492_v8 = vld [vmem:[%s478_s25] sm:$0xf]  ;;  %s1376_s29 = smov 16   ;;  %s1377_s16 = smov 24  }
  0x2d   : > { %650 = vmatpush.bf16.msra.mxu2 %v1167_v13  ;;  %s1157_s23 = sshll.u32 %s1360_s20, 3  ;;  %s1099_s10 = sshll.u32 %s1512_s26, 3 }
  0x2e   : > { %1111 = vmatmul.msk.bf16.vlgmr.msra.gmra.mxu0 %vm513_vm0, %v492_v8  ;;  %s970_s14 = scalar_lea.hbm %s1660_s11, %s1157_s23  ;;  %s959_s20 = scalar_lea.sflag [#allocation7], %s1512_s26 }
  0x2f   : > { %555 = vperm.xlu0 %1241, %v545_v9   ;;  %s974_s27 = sshll.u32 %s970_s14, 4  ;;  %s975_s27 = int_to_ptr.hbm [resolvable:$true] %s974_s27 }
  0x30   : > { %604 = vmatpush.bf16.msra.mxu1 %v1163_v4  ;;  %560 = vperm.xlu1 %1242, %v546_v10   ;;  %s1300_s25 = sshra.s32 %s975_s27, 4  ;;  %s1301_s25 = int_to_ptr.hbm [resolvable:$true] %s1300_s25 }
  0x31   : > { %1138 = vmatmul.msk.bf16.vlgmr.msra.gmra.mxu2 %vm513_vm0, %v539_v14  ;;  %s1302_s30 = scalar_lea.hbm %s1301_s25, 8  ;;  %p1307_p8 = scmp.lt.s32.totalorder %s1301_s25, %s1660_s11 }
  0x32   : > { %p1303_p5 = scmp.ne.s32.totalorder %s1301_s25, %s1302_s30 }
  0x33   : > { %1128 = vmatmul.msk.bf16.vlgmr.msra.gmra.mxu1 %vm513_vm0, %v1165_v7 }
  0x34   : > { %p1304_p6 = pnand %p1303_p5, %p1489_p9 }
  0x36   : > { %p1305_p7 = pneg %p1304_p6 }
  0x43   : > { %1129 = vmatmul.msk.bf16.gmra.mxu1 %vm513_vm0, %v1166_v11 }
  0x99   : > { %v551_v16 = vpop.permute.xlu0 %550 }
  0x9a   : > { %v566_v23 = vpop.permute.xlu1 %565 }
  0xa1   : > { %v556_v26 = vpop.permute.xlu0 %555 }
  0xa2   : > { %v561_v35 = vpop.permute.xlu1 %560 }
  0xab   : > { %v526_v17 = vpop.f32.mrf.mxu0 }
  0xac   : > { %v527_v19 = vadd.f32 %v1243_v15, %v526_v17 }
  0xae   : > { %v530_v21 = vmul.f32 0.35355338, %v527_v19 }
  0xb0   : > { %v606_v18 = vpop.f32.mrf.mxu1  ;;  %v531_v24 = vpack.c.bf16 %v530_v21, %v530_v21 }
  0xb1   : > { %v607_v20 = vadd.f32 %v606_v18, %v551_v16 }
  0xb2   : > { %533 = vst.msk [vmem:[#allocation2] sm:$0xf] %vm532_vm2, %v531_v24 }
  0xb3   : > { %v616_v22 = vpack.c.bf16 %v607_v20, %v607_v20  ;;  %v528_v27 = vpop.f32.mrf.mxu0 }
  0xb4   : > { %v652_v54 = vpop.f32.mrf.mxu2 }
  0xb5   : > { %v664_v25 = vsel %vm662_vm1, %v616_v22, 0  ;;  %v653_v55 = vadd.f32 %v1244_v52, %v652_v54 }
  0xb6   : > { %673 = vmatpush.bf16.msra.mxu3 %v664_v25 }
  0xb7   : > { %v656_v56 = vpack.c.bf16 %v653_v55, %v653_v55 }
  0xb8   : > { %v608_v28 = vpop.f32.mrf.mxu1 }
  0xb9   : > { %v609_v29 = vadd.f32 %v608_v28, %v556_v26  ;;  %v657_v32 = vld [vmem:[#allocation2] sm:$0xf]  ;;  %v800_v57 = vsel %vm662_vm1, %v656_v56, 0  ;;  %v822_v58 = vunpack.c.l.b16 %v656_v56 }
  0xba   : > { %v707_v33 = vld [vmem:[#allocation2] sm:$0xf]  ;;  %1139 = vmatmul.msk.bf16.vlgmr.msra.gmra.mxu3 %vm658_vm3, %v657_v32 }
  0xbb   : > { %v617_v30 = vpack.c.bf16 %v609_v29, %v609_v29  ;;  %v680_v34 = vld [vmem:[#allocation2] sm:$0xf]  ;;  %v709_v36 = vunpack.c.l.b16 %v707_v33  ;;  %v823_v59 = vpack.c.b16 %v822_v58, %v822_v58  ;;  %v1170_v58 = vld [vmem:[%s1658_s9 + $0x8] sm:$0xff] }
  0xbc   : > { %v682_v37 = vunpack.c.l.b16 %v680_v34  ;;  %v734_v42 = vld [vmem:[#allocation2] sm:$0xf]  ;;  %v654_v60 = vpop.f32.mrf.mxu2 }
  0xbd   : > { %v690_v31 = vsel %vm662_vm1, %v617_v30, 0  ;;  %v710_v39 = vpack.c.b16 %v709_v36, %v709_v36  ;;  %v736_v44 = vunpack.c.l.b16 %v734_v42  ;;  %824 = vrot.lane.b32.xlu1 %v823_v59, %s1372_s28 }
  0xbe   : > { %699 = vmatpush.bf16.msrb.mxu3 %v690_v31  ;;  %v683_v40 = vpack.c.b16 %v682_v37, %v682_v37 }
  0xbf   : > { %711 = vrot.lane.b32.xlu0 %v710_v39, %s1371_s17  ;;  %v737_v47 = vpack.c.b16 %v736_v44, %v736_v44 }
  0xc0   : > { %v611_v38 = vpop.f32.mrf.mxu1  ;;  %684 = vrot.lane.b32.xlu2 %v683_v40, %s1372_s28 }
  0xc1   : > { %v612_v41 = vadd.f32 %v611_v38, %v561_v35 }
  0xc2   : > { %809 = vmatpush.bf16.msra.mxu3 %v800_v57 }
  0xc3   : > { %v618_v43 = vpack.c.bf16 %v612_v41, %v612_v41 }
  0xc5   : > { %v717_v45 = vsel %vm662_vm1, %v618_v43, 0 }
  0xc6   : > { %726 = vmatpush.bf16.msrb.mxu0 %v717_v45 }
  0xc7   : > { %888 = vrot.lane.b32.xlu0 %v823_v59, %s1373_s2 }
  0xc8   : > { %v613_v46 = vpop.f32.mrf.mxu1  ;;  %738 = vrot.lane.b32.xlu2 %v737_v47, %s1373_s2  ;;  %v1374_v47 = vmov 0.0  }
  0xc9   : > { %v614_v48 = vadd.f32 %v613_v46, %v566_v23  ;;  %534 = vst.msk [vmem:[#allocation4] sm:$0xff] %vm513_vm0, %v1374_v47 }
  0xcb   : > { %v619_v49 = vpack.c.bf16 %v614_v48, %v614_v48 }
  0xcd   : > { %v744_v50 = vsel %vm662_vm1, %v619_v49, 0 }
  0xce   : > { %753 = vmatpush.bf16.msrb.mxu2 %v744_v50 }
  0xd0   : > { %856 = vrot.lane.b32.xlu2 %v823_v59, %s1371_s17  ;;  %v795_v50 = vld [vmem:[#allocation4] sm:$0xff] }
  0xd1   : > { %v1169_v59 = vld [vmem:[%s1658_s9] sm:$0xff] }
 0x11a   : > { %v685_v51 = vpop.permute.xlu2 %684 }
 0x11b   : > { %1140 = vmatmul.msk.bf16.vlgmr.msrb.gmra.mxu3 %vm658_vm3, %v685_v51 }
 0x11c   : > { %950 = vmatpush.bf16.msrb.mxu3 %v1170_v58 }
 0x120   : > { %951 = vmatpush.bf16.msrb.mxu3 %v1169_v59 }
 0x122   : > { %v739_v53 = vpop.permute.xlu2 %738 }
 0x123   : > { %1142 = vmatmul.msk.bf16.vlgmr.msrb.gmra.mxu2 %vm658_vm3, %v739_v53 }
 0x12a   : > { %v857_v0 = vpop.permute.xlu2 %856 }
 0x12b   : > { %v862_v2 = vsel %vm662_vm1, %v857_v0, 0 }
 0x12c   : > { %871 = vmatpush.bf16.msrb.mxu1 %v862_v2 }
 0x12f   : > { %v825_v6 = vpop.permute.xlu1 %824 }
 0x130   : > { %v830_v9 = vsel %vm662_vm1, %v825_v6, 0 }
 0x131   : > { %v712_v61 = vpop.permute.xlu0 %711  ;;  %839 = vmatpush.bf16.msra.mxu0 %v830_v9 }
 0x132   : > { %1141 = vmatmul.msk.bf16.vlgmr.msrb.gmra.mxu0 %vm658_vm3, %v712_v61 }
 0x139   : > { %v889_v7 = vpop.permute.xlu0 %888 }
 0x13a   : > { %v894_v10 = vsel %vm662_vm1, %v889_v7, 0 }
 0x13b   : > { %903 = vmatpush.bf16.msra.mxu2 %v894_v10 }
 0x13d   : > { %v675_v62 = vpop.f32.mrf.mxu3 }
 0x13e   : > { %679 = vst.msk [vmem:[#allocation3] sm:$0xff] %vm658_vm3, %v675_v62 }
 0x145   : > { %v677_v63 = vpop.f32.mrf.mxu3  ;;  %v761_v12 = vld [vmem:[#allocation3] sm:$0xff] }
 0x19e   : > { %v701_v1 = vpop.f32.mrf.mxu3 }
 0x19f   : > { %706 = vst.msk [vmem:[#allocation3 + $0x8] sm:$0xff] %vm658_vm3, %v701_v1 }
 0x1a6   : > { %v703_v3 = vpop.f32.mrf.mxu3  ;;  %v755_v4 = vpop.f32.mrf.mxu2  ;;  %v762_v11 = vld [vmem:[#allocation3 + $0x8] sm:$0xff] }
 0x1a7   : > { %760 = vst.msk [vmem:[#allocation3 + $0x18] sm:$0xff] %vm658_vm3, %v755_v4  ;;  %v763_v13 = vmax.f32 %v761_v12, %v762_v11 }
 0x1ae   : > { %v757_v5 = vpop.f32.mrf.mxu2  ;;  %v766_v17 = vld [vmem:[#allocation3 + $0x18] sm:$0xff] }
 0x1af   : > { %v728_v8 = vpop.f32.mrf.mxu0 }
 0x1b0   : > { %733 = vst.msk [vmem:[#allocation3 + $0x10] sm:$0xff] %vm658_vm3, %v728_v8 }
 0x1b7   : > { %v764_v14 = vld [vmem:[#allocation3 + $0x10] sm:$0xff]  ;;  %v730_v15 = vpop.f32.mrf.mxu0 }
 0x1b8   : > { %v765_v16 = vmax.f32 %v763_v13, %v764_v14 }
 0x1ba   : > { %v767_v18 = vmax.f32 %v765_v16, %v766_v17 }
 0x1bc   : > { %v768_v19 = vsub.f32 %v761_v12, %v767_v18  ;;  %v774_v20 = vsub.f32 %v762_v11, %v767_v18  ;;  %v780_v21 = vsub.f32 %v764_v14, %v767_v18  ;;  %v786_v22 = vsub.f32 %v766_v17, %v767_v18 }
 0x1be   : > { %v769_v23 = vmul.f32 1.442695, %v768_v19  ;;  %v775_v24 = vmul.f32 1.442695, %v774_v20  ;;  %v781_v25 = vmul.f32 1.442695, %v780_v21 }
 0x1bf   : > { %v787_v26 = vmul.f32 1.442695, %v786_v22 }
 0x1c0   : > { %1246 = vpow2.f32 %v769_v23 }
 0x1c1   : > { %1248 = vpow2.f32 %v775_v24 }
 0x1c2   : > { %1250 = vpow2.f32 %v781_v25 }
 0x1c3   : > { %1252 = vpow2.f32 %v787_v26 }
 0x1c6   : > { %v1247_v27 = vpop.eup %1246 }
 0x1c7   : > { %v1249_v28 = vpop.eup %1248  ;;  %771 = vst.msk [vmem:[#allocation3] sm:$0xff] %vm658_vm3, %v1247_v27 }
 0x1c8   : > { %v1251_v29 = vpop.eup %1250  ;;  %777 = vst.msk [vmem:[#allocation3 + $0x8] sm:$0xff] %vm658_vm3, %v1249_v28  ;;  %v778_v30 = vadd.f32 %v1249_v28, %v1247_v27 }
 0x1c9   : > { %v1253_v31 = vpop.eup %1252  ;;  %783 = vst.msk [vmem:[#allocation3 + $0x10] sm:$0xff] %vm658_vm3, %v1251_v29 }
 0x1ca   : > { %v784_v32 = vadd.f32 %v1251_v29, %v778_v30  ;;  %789 = vst.msk [vmem:[#allocation3 + $0x18] sm:$0xff] %vm658_vm3, %v1253_v31 }
 0x1cc   : > { %v790_v33 = vadd.f32 %v1253_v31, %v784_v32 }
 0x1ce   : > { %1254 = vrcp.f32 %v790_v33  ;;  %v792_v34 = vld [vmem:[#allocation3] sm:$0xff] }
 0x1cf   : > { %v817_v36 = vld [vmem:[#allocation3 + $0x8] sm:$0xff] }
 0x1d0   : > { %v852_v37 = vld [vmem:[#allocation3 + $0x10] sm:$0xff] }
 0x1d1   : > { %v884_v38 = vld [vmem:[#allocation3 + $0x18] sm:$0xff] }
 0x1d4   : > { %v1255_v35 = vpop.eup %1254 }
 0x1d5   : > { %v793_v39 = vmul.f32 %v1255_v35, %v792_v34  ;;  %v818_v40 = vmul.f32 %v1255_v35, %v817_v36  ;;  %v853_v41 = vmul.f32 %v1255_v35, %v852_v37  ;;  %v885_v42 = vmul.f32 %v1255_v35, %v884_v38 }
 0x1d7   : > { %v794_v43 = vpack.c.bf16 %v793_v39, %v793_v39  ;;  %v819_v44 = vpack.c.bf16 %v818_v40, %v818_v40  ;;  %v854_v45 = vpack.c.bf16 %v853_v41, %v853_v41  ;;  %v886_v46 = vpack.c.bf16 %v885_v42, %v885_v42 }
 0x1d9   : > { %1143 = vmatmul.msk.bf16.vlgmr.msra.gmra.mxu3 %vm658_vm3, %v794_v43  ;;  %1144 = vmatmul.msk.bf16.vlgmr.msra.gmra.mxu0 %vm658_vm3, %v819_v44 }
 0x1da   : > { %1145 = vmatmul.msk.bf16.vlgmr.msrb.gmra.mxu1 %vm658_vm3, %v854_v45  ;;  %1146 = vmatmul.msk.bf16.vlgmr.msra.gmra.mxu2 %vm658_vm3, %v886_v46 }
 0x256   : > { %v841_v48 = vpop.f32.mrf.mxu0 }
 0x257   : > { %v873_v49 = vpop.f32.mrf.mxu1  ;;  %846 = vrot.lane.b32.xlu1 %v841_v48, %s1375_s24 }
 0x258   : > { %878 = vrot.lane.b32.xlu2 %v873_v49, %s1376_s29  ;;  %s1678_s29 = sld [smem:[#allocation16_spill]] }
 0x25c   : > { %v811_v51 = vpop.f32.mrf.mxu3 }
 0x25d   : > { %v815_v52 = vadd.f32 %v811_v51, %v795_v50  ;;  %v905_v53 = vpop.f32.mrf.mxu2 }
 0x25e   : > { %910 = vrot.lane.b32.xlu0 %v905_v53, %s1377_s16  ;;  %v843_v54 = vpop.f32.mrf.mxu0  ;;  %v1245_v7 = vld [vmem:[%s1678_s29] ss:$0 sm:$0xff]  ;;  %s471_s16 = scalar_lea.vmem [#allocation8], %s1099_s10  ;;  %s1306_s10 = scalar_lea.hbm %s1660_s11, 16 }
 0x25f   : > { %816 = vst.msk [vmem:[#allocation4] sm:$0xff] %vm658_vm3, %v815_v52  ;;  %v875_v55 = vpop.f32.mrf.mxu1  ;;  %s972_s15 = sshll.u32 %s471_s16, 4  ;;  %p1308_p10 = scmp.lt.s32.totalorder %s1306_s10, %s1302_s30  ;;  %s973_s15 = int_to_ptr.vmem [resolvable:$true] %s972_s15 }
 0x261   : > { %p1309_p13 = por %p1308_p10, %p1307_p8 }
 0x263   : > { %p1310_p0 = pnand %p1309_p13, %p1305_p7 }
 0x264   : > { %v813_v56 = vpop.f32.mrf.mxu3 }
 0x265   : > { %v907_v57 = vpop.f32.mrf.mxu2 }
 0x266   : > { %v820_v61 = vld [vmem:[#allocation4] sm:$0xff] }
 0x2b2   : > { %v879_v63 = vpop.permute.xlu2 %878 }
 0x2c9   : > { %v847_v60 = vpop.permute.xlu1 %846 }
 0x2ca   : > { %v849_v62 = vadd.f32 %v847_v60, %v820_v61 }
 0x2cc   : > { %851 = vst.msk [vmem:[#allocation4] sm:$0xff] %vm850_vm4, %v849_v62 }
 0x2d0   : > { %v911_v2 = vpop.permute.xlu0 %910 }
 0x2d3   : > { %v855_v0 = vld [vmem:[#allocation4] sm:$0xff] }
 0x2d4   : > { %v881_v1 = vadd.f32 %v879_v63, %v855_v0 }
 0x2d6   : > { %883 = vst.msk [vmem:[#allocation4] sm:$0xff] %vm882_vm5, %v881_v1 }
 0x2dd   : > { %v887_v3 = vld [vmem:[#allocation4] sm:$0xff] }
 0x2de   : > { %v913_v4 = vadd.f32 %v911_v2, %v887_v3 }
 0x2e0   : > { %915 = vst.msk [vmem:[#allocation4] sm:$0xff] %vm914_vm6, %v913_v4 }
 0x2e7   : > { %v919_v5 = vld [vmem:[#allocation4] sm:$0xff] }
 0x2e8   : > { %v920_v6 = vpack.c.bf16 %v919_v5, %v919_v5 }
 0x2ea   : > { %1155 = vmatmul.msk.bf16.vlgmr.msrb.gmra.mxu3 %vm513_vm0, %v920_v6 }
 0x36d   : > { %v953_v8 = vpop.f32.mrf.mxu3 }
 0x36e   : > { %v954_v9 = vadd.f32 %v1245_v7, %v953_v8 }
 0x370   : > { %957 = vst.msk [vmem:[%s471_s16] sm:$0xff] %vm513_vm0, %v954_v9 }
 0x371   : > { %1313 = shalt.err (!%p1310_p0)
}
 0x372   : > { %1173 = dma.vmem_to_hbm [thread:$0]  (%p1489_p9), %s973_s15, 128, %s975_s27, %s959_s20  }
 0x375   : > { %v955_v10 = vpop.f32.mrf.mxu3 }
 0x376 PF: > { %s1679_s26 = sld [smem:[#allocation11_spill]]  ;;  %p1180_p1 = pnand %p1094_p12, %p1496_p11 }
 0x378   : > { %p1181_p2 = pneg %p1180_p1 }
 0x37c   : > { %s986_s21 = sand.u32 1, %s1679_s26  }
 0x37d   : > { %s987_s24 = scalar_lea.sflag [#allocation7], %s986_s21 }
 0x37e   : > { %1343 = dma.done.wait (%p1181_p2), %s987_s24, 128  }
 0x37f   : > { %1345 = vsyncadd (%p1181_p2), %s987_s24, 4294967168  ;;  %s27_s22 = sadd.s32 1, %s1368_s22   ;;  %s1680_s20 = sld [smem:[#allocation12_spill]] }
 0x380   : > { %p24_p3 = scmp.ge.s32.totalorder %s27_s22, 4   ;;  %s1681_s21 = sld [smem:[#allocation13_spill]] }
 0x381   : > { %s1682_s17 = smov %s1352_s18  ;;  %s1683_s18 = smov %s1356_s19 }
 0x382   : > { %s1684_s19 = smov %s1494_s12  ;;  %26 = sbr.rel (!%p24_p3) target bundleno = 9 (0x9), region = 126 }
 0x387   :  { %993 = vsyncpa [#allocation6], 1 }
 0x388   :  { %995 = vsyncpa [#allocation6 + $0x1], 1 }
 0x389   :  { %996 = vsyncpa [#allocation7], 1 }
 0x38a   :  { %998 = vsyncpa [#allocation7 + $0x1], 1 }

</bundles_post_ra>
